<compile_context>
chip_gen: v6e
topology: v6e:2x2x1
jax: 0.10.0
libtpu: 0.0.40
codegen_flags: <defaults>
</compile_context>

<pallas_src>
import functools

import jax
import jax.numpy as jnp
from jax.experimental import pallas as pl
from jax.experimental.pallas import tpu as pltpu

LANE = 128


def _round_up(x, m):
    return (x + m - 1) // m * m


# --------------------------------------------------------------------------------------
# Kernels
# --------------------------------------------------------------------------------------

def _proj_kernel(x_ref, w_ref, out_ref):
    # out = x @ [w_fc_pad | w_fc@attn_l | w_fc@attn_r]   (folded GAT projection)
    out_ref[...] = jnp.dot(x_ref[...], w_ref[...], preferred_element_type=jnp.float32)


def _attention_tile(adj_ref, el_row_ref, er_col_ref, negative_slope):
    """Recompute the (TILE_DST, N) attention slab from resident el/er + int8 adjacency."""
    mask = adj_ref[...].astype(jnp.int32) > 0                    # (T, N) edge mask
    s = er_col_ref[...] + el_row_ref[...]                        # (T,1)+(1,N) -> (T,N)
    s = jnp.where(s > 0, s, negative_slope * s)                  # LeakyReLU
    s = jnp.where(mask, s, jnp.float32(-1e30))                   # mask non-edges
    m = jnp.max(s, axis=-1, keepdims=True)
    p = jnp.exp(s - m)                                           # non-edges underflow to 0
    denom = jnp.sum(p, axis=-1, keepdims=True)                   # >= 1 (self loops assumed)
    return p * pl.reciprocal(denom, approx=True)                 # EUP reciprocal


def _gat_kernel(adj_ref, el_ref, er_ref, h0_ref, b_ref, out_ref, *, negative_slope):
    alpha = _attention_tile(adj_ref, el_ref, er_ref, negative_slope)
    agg = jnp.dot(alpha.astype(jnp.bfloat16), h0_ref[...].astype(jnp.bfloat16),
                  preferred_element_type=jnp.float32)
    h = agg + b_ref[...]
    # ELU; clamp the exp argument so the untaken branch never produces inf.
    out_ref[...] = jnp.where(h > 0, h, jnp.exp(jnp.minimum(h, 0.0)) - 1.0)


def _graphconv_kernel(adj_ref, el_ref, er_ref, h_ref, w_ref, b_ref, out_ref, *,
                      negative_slope):
    alpha = _attention_tile(adj_ref, el_ref, er_ref, negative_slope)
    agg = jnp.dot(alpha.astype(jnp.bfloat16), h_ref[...].astype(jnp.bfloat16),
                  preferred_element_type=jnp.float32)
    out_ref[...] = (jnp.dot(agg, w_ref[...], preferred_element_type=jnp.float32)
                    + b_ref[...])


# --------------------------------------------------------------------------------------
# Wrapper
# --------------------------------------------------------------------------------------

def sgat_forward(x, adj, params, *, negative_slope=0.2, tile_dst=128):
    """SGAT forward pass. adj[dst, src] != 0 marks an edge src->dst (self loops required,
    matching DGL's allow_zero_in_degree=False)."""
    n, in_dim = x.shape
    hidden = params["w_fc"].shape[1]
    n_classes = params["w2"].shape[1]
    f32 = jnp.float32

    hp = _round_up(hidden, LANE)          # lane-dense hidden width
    cp = _round_up(n_classes, LANE)       # lane-dense logits width
    tile = min(tile_dst, _round_up(n, 8))
    n_pad = _round_up(n, tile)
    grid = (n_pad // tile,)

    # ---- parameter folding / padding (layout plumbing, done once in the wrapper) ----
    w_fc = params["w_fc"].astype(f32)
    w_el = w_fc @ params["attn_l"].reshape(hidden, 1).astype(f32)      # (in_dim, 1)
    w_er = w_fc @ params["attn_r"].reshape(hidden, 1).astype(f32)      # (in_dim, 1)
    w_fc_p = jnp.pad(w_fc, ((0, 0), (0, hp - hidden)))
    w_all = jnp.concatenate([w_fc_p, w_el, w_er], axis=1)              # (in_dim, hp+2)

    b_gat = jnp.pad(params["b_gat"].reshape(1, hidden).astype(f32),
                    ((0, 0), (0, hp - hidden)))
    w1 = jnp.pad(params["w1"].astype(f32), ((0, hp - hidden), (0, hp - hidden)))
    b1 = jnp.pad(params["b1"].reshape(1, hidden).astype(f32), ((0, 0), (0, hp - hidden)))
    w2 = jnp.pad(params["w2"].astype(f32), ((0, hp - hidden), (0, cp - n_classes)))
    b2 = jnp.pad(params["b2"].reshape(1, n_classes).astype(f32),
                 ((0, 0), (0, cp - n_classes)))

    # ---- node padding; padded nodes get a self loop so edge_softmax stays defined ----
    x_p = jnp.pad(x.astype(f32), ((0, n_pad - n), (0, 0)))
    adj_i8 = jnp.pad((adj > 0).astype(jnp.int8), ((0, n_pad - n), (0, n_pad - n)))
    if n_pad > n:
        pad_ids = jnp.arange(n, n_pad)
        adj_i8 = adj_i8.at[pad_ids, pad_ids].set(1)

    # ---- VMEM budget: keep double-buffered tiles + temporaries well under scoped limit ----
    vmem_est = (2 * tile * n_pad                       # int8 adj tiles (double buffered)
                + 4 * tile * n_pad * 4                 # attention temporaries (f32)
                + n_pad * hp * (4 + 2)                 # resident features f32 + bf16 copy
                + hp * max(hp, cp) * 4                 # resident weights
                + 4 * tile * max(hp, cp) * 4)          # output tiles (double buffered)
    vmem_limit = int(min(max(2 * vmem_est, 32 << 20), 48 << 20))
    cparams = pltpu.CompilerParams(dimension_semantics=("parallel",),
                                   vmem_limit_bytes=vmem_limit)

    # ---- stage 0: folded projection  hp_all = x @ [w_fc | w_el | w_er] ----
    hp_all = pl.pallas_call(
        _proj_kernel,
        out_shape=jax.ShapeDtypeStruct((n_pad, hp + 2), f32),
        grid=grid,
        in_specs=[pl.BlockSpec((tile, in_dim), lambda i: (i, 0)),
                  pl.BlockSpec((in_dim, hp + 2), lambda i: (0, 0))],
        out_specs=pl.BlockSpec((tile, hp + 2), lambda i: (i, 0)),
        compiler_params=cparams,
        cost_estimate=pl.CostEstimate(
            flops=2 * n_pad * in_dim * (hp + 2),
            transcendentals=0,
            bytes_accessed=n_pad * (in_dim + hp + 2) * 4),
    )(x_p, w_all)

    h0 = hp_all[:, :hp]                      # (n_pad, hp)  fc(x), zero in padded lanes
    el_row = hp_all[:, hp:hp + 1].T          # (1, n_pad)   <fc(x), attn_l>
    er_col = hp_all[:, hp + 1:hp + 2]        # (n_pad, 1)   <fc(x), attn_r>

    def _specs(feat_dim, out_dim, with_weight):
        in_specs = [
            pl.BlockSpec((tile, n_pad), lambda i: (i, 0)),       # adj tile (int8)
            pl.BlockSpec((1, n_pad), lambda i: (0, 0)),          # el row (resident)
            pl.BlockSpec((tile, 1), lambda i: (i, 0)),           # er tile
            pl.BlockSpec((n_pad, feat_dim), lambda i: (0, 0)),   # node features (resident)
        ]
        if with_weight:
            in_specs.append(pl.BlockSpec((feat_dim, out_dim), lambda i: (0, 0)))
        in_specs.append(pl.BlockSpec((1, out_dim), lambda i: (0, 0)))  # bias
        return in_specs, pl.BlockSpec((tile, out_dim), lambda i: (i, 0))

    softmax_flops = 8 * n_pad * n_pad
    agg_flops = 2 * n_pad * n_pad * hp
    base_bytes = n_pad * n_pad + 2 * n_pad * hp * 4      # adj (int8) + features in/out

    # ---- stage 1: GATConv aggregation + bias + ELU ----
    in_specs, out_spec = _specs(hp, hp, with_weight=False)
    h1 = pl.pallas_call(
        functools.partial(_gat_kernel, negative_slope=negative_slope),
        out_shape=jax.ShapeDtypeStruct((n_pad, hp), f32),
        grid=grid, in_specs=in_specs, out_specs=out_spec,
        compiler_params=cparams,
        cost_estimate=pl.CostEstimate(flops=agg_flops + softmax_flops,
                                      transcendentals=2 * n_pad * n_pad,
                                      bytes_accessed=base_bytes),
    )(adj_i8, el_row, er_col, h0, b_gat)

    gc_cost = pl.CostEstimate(flops=agg_flops + softmax_flops + 2 * n_pad * hp * hp,
                              transcendentals=n_pad * n_pad,
                              bytes_accessed=base_bytes + hp * hp * 4)

    # ---- stage 2: GraphConv(H, H, norm='none') with edge_weight = attention ----
    in_specs, out_spec = _specs(hp, hp, with_weight=True)
    h2 = pl.pallas_call(
        functools.partial(_graphconv_kernel, negative_slope=negative_slope),
        out_shape=jax.ShapeDtypeStruct((n_pad, hp), f32),
        grid=grid, in_specs=in_specs, out_specs=out_spec,
        compiler_params=cparams, cost_estimate=gc_cost,
    )(adj_i8, el_row, er_col, h1, w1, b1)

    # ---- stage 3: GraphConv(H, C, norm='none') with edge_weight = attention ----
    in_specs, out_spec = _specs(hp, cp, with_weight=True)
    logits_p = pl.pallas_call(
        functools.partial(_graphconv_kernel, negative_slope=negative_slope),
        out_shape=jax.ShapeDtypeStruct((n_pad, cp), f32),
        grid=grid, in_specs=in_specs, out_specs=out_spec,
        compiler_params=cparams, cost_estimate=gc_cost,
    )(adj_i8, el_row, er_col, h2, w2, b2)

    return logits_p[:n, :n_classes]


# --------------------------------------------------------------------------------------
# Parameter / graph construction for the demo
# --------------------------------------------------------------------------------------

def make_params(key, in_dim, hidden, num_classes):
    ks = jax.random.split(key, 6)
    scale = 0.1
    return {
        # GATConv: fc weight (in_dim, H), attention vectors (1, H), bias (1, H)
        "w_fc":   scale * jax.random.normal(ks[0], (in_dim, hidden), jnp.float32),
        "attn_l": scale * jax.random.normal(ks[1], (1, hidden), jnp.float32),
        "attn_r": scale * jax.random.normal(ks[2], (1, hidden), jnp.float32),
        "b_gat":  jnp.zeros((1, hidden), jnp.float32),
        # GraphConv(H, H)
        "w1": scale * jax.random.normal(ks[3], (hidden, hidden), jnp.float32),
        "b1": jnp.zeros((1, hidden), jnp.float32),
        # GraphConv(H, C)
        "w2": scale * jax.random.normal(ks[4], (hidden, num_classes), jnp.float32),
        "b2": jnp.zeros((1, num_classes), jnp.float32),
    }


def make_graph(key, n_nodes, p_edge=0.1):
    # random directed graph + self loops (guarantees in-degree >= 1, as DGL requires)
    rand = jax.random.uniform(key, (n_nodes, n_nodes))
    adj = (rand < p_edge).astype(jnp.float32)
    adj = jnp.maximum(adj, jnp.eye(n_nodes, dtype=jnp.float32))   # A[dst, src]
    return adj


if __name__ == "__main__":
    # small, module-consistent shapes: num_layers=2 -> [GATConv, GraphConv, GraphConv]
    N, IN_DIM, HIDDEN, NUM_CLASSES = 64, 16, 32, 4
    NEGATIVE_SLOPE = 0.2

    root = jax.random.PRNGKey(0)
    k_feat, k_graph, k_param = jax.random.split(root, 3)

    x = jax.random.normal(k_feat, (N, IN_DIM), jnp.float32)       # node features
    adj = make_graph(k_graph, N)                                  # dense adjacency mask
    params = make_params(k_param, IN_DIM, HIDDEN, NUM_CLASSES)

    # TODO(synk): feat_drop / attn_drop are inference no-ops here (dropout not applied).
    logits = sgat_forward(x, adj, params, negative_slope=NEGATIVE_SLOPE)
    jax.block_until_ready(logits)

    assert logits.shape == (N, NUM_CLASSES)
    assert bool(jnp.all(jnp.isfinite(logits)))
    print("KERNEL_OK")
</pallas_src>

<mosaic_0001>
module attributes {stable_mosaic.version = 11 : i64} {
  func.func @_proj_kernel(%arg0: i32, %arg1: memref<64x16xf32, #tpu.memory_space<vmem>>, %arg2: memref<16x130xf32, #tpu.memory_space<vmem>>, %arg3: memref<64x130xf32, #tpu.memory_space<vmem>>) attributes {dimension_semantics = [#tpu.dimension_semantics<parallel>], iteration_bounds = array<i64: 1>, scalar_prefetch = 0 : i64, scratch_operands = 0 : i64, tpu.core_type = #tpu.core_type<tc>, window_params = [{transform_indices = @transform_0, window_bounds = array<i64: 64, 16>}, {pipeline_mode = #tpu.pipeline_mode<synchronous>, transform_indices = @transform_1, window_bounds = array<i64: 16, 130>}, {transform_indices = @transform_2, window_bounds = array<i64: 64, 130>}]} {
    %c0 = arith.constant 0 : index
    %c0_0 = arith.constant 0 : index
    %0 = vector.load %arg1[%c0, %c0_0] : memref<64x16xf32, #tpu.memory_space<vmem>>, vector<64x16xf32>
    %c0_1 = arith.constant 0 : index
    %c0_2 = arith.constant 0 : index
    %1 = vector.load %arg2[%c0_1, %c0_2] : memref<16x130xf32, #tpu.memory_space<vmem>>, vector<16x130xf32>
    %cst = arith.constant dense<0.000000e+00> : vector<64x130xf32>
    %2 = tpu.matmul %0, %1, %cst {dimension_numbers = #tpu.dot_dimension_numbers<[1], [0], [0], [1], [0, 0, 1, 1], [], []>} : vector<64x16xf32>, vector<16x130xf32>, vector<64x130xf32> -> vector<64x130xf32>
    %c0_3 = arith.constant 0 : index
    %c0_4 = arith.constant 0 : index
    %3 = vector.load %arg3[%c0_3, %c0_4] : memref<64x130xf32, #tpu.memory_space<vmem>>, vector<64x130xf32>
    tpu.vector_store %arg3[%c0_3, %c0_4], %2 {strides = array<i32>} : memref<64x130xf32, #tpu.memory_space<vmem>>, vector<64x130xf32>,
    return
  }
  func.func @transform_0(%arg0: i32) -> (i32, i32) {
    %c0_i32 = arith.constant 0 : i32
    %c0_i32_0 = arith.constant 0 : i32
    return %arg0, %c0_i32 : i32, i32
  }
  func.func @transform_1(%arg0: i32) -> (i32, i32) {
    %c0_i32 = arith.constant 0 : i32
    %c0_i32_0 = arith.constant 0 : i32
    %c0_i32_1 = arith.constant 0 : i32
    return %c0_i32, %c0_i32_0 : i32, i32
  }
  func.func @transform_2(%arg0: i32) -> (i32, i32) {
    %c0_i32 = arith.constant 0 : i32
    %c0_i32_0 = arith.constant 0 : i32
    return %arg0, %c0_i32 : i32, i32
  }
}

</mosaic_0001>

<bundles_post_ra>
// kernel: tpu_custom_call.1
= control target key start
LH: loop header
LB: loop body
LE: loop exit
PB: predicated region body
PF: predicated region fallthrough
CT: control target
= control target key end

     0   :  { %vm24_vm0 = vcmask 130048   ;;  %s307_s0 = inlined_call_operand.vmem [shape: f32[64,16], index: 0, kind: input, shape index: {}]   ;;  %s308_s1 = inlined_call_operand.vmem [shape: f32[16,130], index: 1, kind: input, shape index: {}]   ;;  %s309_s2 = inlined_call_operand.hbm [shape: f32[64,130], index: 2, kind: output, shape index: {}]  }
   0x1   :  { %v23_v0 = vld [vmem:[%s308_s1 + $0x18] sm:$0xff]  ;;  %v22_v1 = vld [vmem:[%s308_s1 + $0x10] sm:$0xff]  ;;  %v21_v2 = vld [vmem:[%s308_s1 + $0x8] sm:$0xff] }
   0x2   :  { %77 = vmatprep.subr.mxu0 %v23_v0  ;;  %203 = vmatprep.subr.mxu1 %v23_v0  ;;  %v20_v3 = vld [vmem:[%s308_s1] sm:$0xff] }
   0x3   :  { %78 = vmatpush1.msra.mxu0 %v22_v1  ;;  %205 = vmatpush1.msra.mxu1 %v22_v1  ;;  %v12_v4 = vld [vmem:[%s307_s0] sm:$0xff] }
   0x4   :  { %79 = vmatprep.subr.mxu0 %v21_v2  ;;  %204 = vmatprep.subr.mxu1 %v21_v2  ;;  %v16_v5 = vld [vmem:[%s307_s0 + $0x20] sm:$0xff] }
   0x5   :  { %80 = vmatpush1.msra.mxu0 %v20_v3  ;;  %206 = vmatpush1.msra.mxu1 %v20_v3 }
   0x6   :  { %7 = vsyncpa [#allocation3], 0  ;;  %v233_v6 = vmov 0.0   ;;  %v13_v7 = vld [vmem:[%s307_s0 + $0x8] sm:$0xff]  ;;  %v14_v9 = vld [vmem:[%s307_s0 + $0x10] sm:$0xff]  ;;  %vm163_vm1 = vcmask 15360  }
   0x7   :  { %113 = vmatprep.mubr.f32.mxu0 %v233_v6  ;;  %137 = vmatprep.mubr.f32.mxu1 %v233_v6  ;;  %v17_v8 = vld [vmem:[%s307_s0 + $0x28] sm:$0xff]  ;;  %v18_v10 = vld [vmem:[%s307_s0 + $0x30] sm:$0xff]  ;;  %v15_v11 = vld [vmem:[%s307_s0 + $0x18] sm:$0xff] }
   0x8   :  { %195 = vmatmul.mubr.msk.f32.vlgmr.msra.gmra.mxu0 %vm24_vm0, %v12_v4  ;;  %199 = vmatmul.mubr.msk.f32.vlgmr.msra.gmra.mxu1 %vm24_vm0, %v16_v5  ;;  %v19_v12 = vld [vmem:[%s307_s0 + $0x38] sm:$0xff]  ;;  %s234_s0 = smov [#allocation2]  }
   0x9   :  { %119 = vmatprep.mubr.f32.mxu0 %v233_v6  ;;  %143 = vmatprep.mubr.f32.mxu1 %v233_v6  ;;  %s184_s4 = sshll.u32 %s234_s0, 4  ;;  %s185_s4 = int_to_ptr.vmem [resolvable:$true] %s184_s4 }
   0xa   :  { %s211_s5 = scalar_lea.vmem %s185_s4, 2048  ;;  %p216_p1 = scmp.lt.s32.totalorder %s185_s4, %s185_s4 }
   0xb   :  { %p212_p0 = scmp.ne.s32.totalorder %s185_s4, %s211_s5  ;;  %p217_p2 = scmp.lt.s32.totalorder %s211_s5, %s211_s5 }
   0xc   :  { %196 = vmatmul.mubr.msk.f32.gmra.mxu0 %vm24_vm0, %v13_v7  ;;  %200 = vmatmul.mubr.msk.f32.gmra.mxu1 %vm24_vm0, %v17_v8 }
   0xd   :  { %125 = vmatprep.mubr.f32.mxu0 %v233_v6  ;;  %149 = vmatprep.mubr.f32.mxu1 %v233_v6  ;;  %p218_p3 = por %p217_p2, %p216_p1 }
   0xf   :  { %p219_p4 = pnand %p218_p3, %p212_p0 }
  0x10   :  { %197 = vmatmul.mubr.msk.f32.gmra.mxu0 %vm24_vm0, %v14_v9  ;;  %201 = vmatmul.mubr.msk.f32.gmra.mxu1 %vm24_vm0, %v18_v10 }
  0x11   :  { %131 = vmatprep.mubr.f32.mxu0 %v233_v6  ;;  %155 = vmatprep.mubr.f32.mxu1 %v233_v6 }
  0x14   :  { %198 = vmatmul.mubr.msk.f32.gmra.mxu0 %vm24_vm0, %v15_v11  ;;  %202 = vmatmul.mubr.msk.f32.gmra.mxu1 %vm24_vm0, %v19_v12 }
  0xc8   :  { %v115_v13 = vpop.f32.mrf.mxu0  ;;  %v139_v14 = vpop.f32.mrf.mxu1 }
  0xc9   :  { %162 = vst [vmem:[#allocation2] sm:$0xff] %v115_v13  ;;  %171 = vst [vmem:[#allocation2 + $0x40] sm:$0xff] %v139_v14 }
  0xca   :  { %v117_v15 = vpop.f32.mrf.mxu0  ;;  %v141_v16 = vpop.f32.mrf.mxu1 }
  0xcb   :  { %164 = vst.msk [vmem:[#allocation2 + $0x8] sm:$0xff] %vm163_vm1, %v117_v15  ;;  %172 = vst.msk [vmem:[#allocation2 + $0x48] sm:$0xff] %vm163_vm1, %v141_v16 }
  0xcc   :  { %v121_v17 = vpop.f32.mrf.mxu0  ;;  %v145_v18 = vpop.f32.mrf.mxu1 }
  0xcd   :  { %165 = vst [vmem:[#allocation2 + $0x10] sm:$0xff] %v121_v17  ;;  %173 = vst [vmem:[#allocation2 + $0x50] sm:$0xff] %v145_v18 }
  0xce   :  { %v123_v19 = vpop.f32.mrf.mxu0  ;;  %v147_v20 = vpop.f32.mrf.mxu1 }
  0xcf   :  { %166 = vst.msk [vmem:[#allocation2 + $0x18] sm:$0xff] %vm163_vm1, %v123_v19  ;;  %174 = vst.msk [vmem:[#allocation2 + $0x58] sm:$0xff] %vm163_vm1, %v147_v20 }
  0xd0   :  { %v127_v21 = vpop.f32.mrf.mxu0  ;;  %v151_v22 = vpop.f32.mrf.mxu1 }
  0xd1   :  { %167 = vst [vmem:[#allocation2 + $0x20] sm:$0xff] %v127_v21  ;;  %175 = vst [vmem:[#allocation2 + $0x60] sm:$0xff] %v151_v22 }
  0xd2   :  { %v129_v23 = vpop.f32.mrf.mxu0  ;;  %v153_v24 = vpop.f32.mrf.mxu1 }
  0xd3   :  { %168 = vst.msk [vmem:[#allocation2 + $0x28] sm:$0xff] %vm163_vm1, %v129_v23  ;;  %176 = vst.msk [vmem:[#allocation2 + $0x68] sm:$0xff] %vm163_vm1, %v153_v24 }
  0xd4   :  { %v133_v25 = vpop.f32.mrf.mxu0  ;;  %v157_v26 = vpop.f32.mrf.mxu1 }
  0xd5   :  { %169 = vst [vmem:[#allocation2 + $0x30] sm:$0xff] %v133_v25  ;;  %177 = vst [vmem:[#allocation2 + $0x70] sm:$0xff] %v157_v26 }
  0xd6   :  { %v135_v27 = vpop.f32.mrf.mxu0  ;;  %v159_v28 = vpop.f32.mrf.mxu1 }
  0xd7   :  { %170 = vst.msk [vmem:[#allocation2 + $0x38] sm:$0xff] %vm163_vm1, %v135_v27  ;;  %178 = vst.msk [vmem:[#allocation2 + $0x78] sm:$0xff] %vm163_vm1, %v159_v28 }
  0xd8   :  { %222 = shalt.err (!%p219_p4)
}
  0xd9   :  { %s235_s6 = smov 256   ;;  %s236_s7 = smov 16  }
  0xda   :  { %190 = dma.vmem_to_hbm [thread:$0]  %s185_s4, 2048, %s309_s2, [#allocation3], %s235_s6, %s235_s6, %s236_s7  }
  0xdb   :  { %231 = dma.done.wait [#allocation3], 2048  }
  0xdc   :  { %232 = vsyncadd [#allocation3], 4294965248 }
  0xdd   :  { %194 = vsyncpa [#allocation3], 1 }

</bundles_post_ra>
